<compile_context>
chip_gen: v5e
topology: v5e:2x2
jax: 0.10.0
libtpu: 0.0.40
codegen_flags: <defaults>
</compile_context>

<pallas_src>
import jax
import jax.numpy as jnp
from jax.experimental import pallas as pl
from jax.experimental.pallas import tpu as pltpu


def _pick_seq_tile(seq_len: int) -> int:
    """Largest multiple-of-8 tile (<=512) that divides seq_len, else full."""
    for ts in (512, 256, 128, 64, 32, 16, 8):
        if seq_len % ts == 0:
            return ts
    return seq_len  # full-extent block is always legal


def _self_attention_kernel(q_ref, val_ref, w1_ref, b1_ref, vw_ref, vb_ref,
                           ctx_ref, score_ref, num_acc, den_acc):
    s_idx = pl.program_id(1)

    @pl.when(s_idx == 0)
    def _init():
        num_acc[...] = jnp.zeros_like(num_acc)
        den_acc[...] = jnp.zeros_like(den_acc)

    q = q_ref[0]        # (TS, Din)
    vals = val_ref[0]   # (TS, Dv)

    # h = tanh(q @ W1 + b1)  -- MXU matmul, f32 accumulation, EUP tanh.
    h = jnp.tanh(
        jnp.dot(q, w1_ref[...], preferred_element_type=jnp.float32)
        + b1_ref[...])                                        # (TS, Dout)

    # score = sigmoid(h @ v_w + v_b). v_w is kept as a (1, Dout) row so the
    # contraction is a cheap lane (XLU) reduction instead of an N=1 matmul.
    logits = jnp.sum(h * vw_ref[...], axis=-1, keepdims=True) + vb_ref[...]
    score = 1.0 / (1.0 + jnp.exp(-logits))                    # (TS, 1)

    score_ref[...] = score[None].astype(score_ref.dtype)      # (1, TS, 1)

    # Running numerator / denominator of the normalized weighted sum.
    num_acc[...] += jnp.sum(score * vals.astype(jnp.float32),
                            axis=0, keepdims=True)            # (1, Dv)
    den_acc[...] += jnp.sum(score, axis=0, keepdims=True)     # (1, 1)

    @pl.when(s_idx == pl.num_programs(1) - 1)
    def _finalize():
        inv = pl.reciprocal(den_acc[...], approx=False)       # exact 1/den
        ctx = num_acc[...] * inv                              # (1, Dv)
        ctx_ref[...] = ctx[None].astype(ctx_ref.dtype)        # (1, 1, Dv)


def self_attention(query, values, w1, b1, v_w, v_b):
    """Pallas forward pass. Returns (context_vector (B, Dv), score (B, S, 1))."""
    B, S, Din = query.shape
    _, _, Dv = values.shape
    Dout = w1.shape[1]

    TS = _pick_seq_tile(S)
    n_s = S // TS

    b1_2d = jnp.asarray(b1, jnp.float32).reshape(1, Dout)
    vw_2d = jnp.asarray(v_w, jnp.float32).reshape(1, Dout)
    vb_2d = jnp.asarray(v_b, jnp.float32).reshape(1, 1)

    ctx3, score = pl.pallas_call(
        _self_attention_kernel,
        out_shape=(
            jax.ShapeDtypeStruct((B, 1, Dv), query.dtype),
            jax.ShapeDtypeStruct((B, S, 1), query.dtype),
        ),
        grid_spec=pltpu.PrefetchScalarGridSpec(
            num_scalar_prefetch=0,
            grid=(B, n_s),
            in_specs=[
                pl.BlockSpec((1, TS, Din), lambda b, s: (b, s, 0)),   # query
                pl.BlockSpec((1, TS, Dv), lambda b, s: (b, s, 0)),    # values
                pl.BlockSpec((Din, Dout), lambda b, s: (0, 0)),       # W1
                pl.BlockSpec((1, Dout), lambda b, s: (0, 0)),         # b1
                pl.BlockSpec((1, Dout), lambda b, s: (0, 0)),         # V weight
                pl.BlockSpec((1, 1), lambda b, s: (0, 0)),            # V bias
            ],
            out_specs=[
                pl.BlockSpec((1, 1, Dv), lambda b, s: (b, 0, 0)),     # context
                pl.BlockSpec((1, TS, 1), lambda b, s: (b, s, 0)),     # score
            ],
            scratch_shapes=[
                pltpu.VMEM((1, Dv), jnp.float32),   # num = sum_s score*values
                pltpu.VMEM((1, 1), jnp.float32),    # den = sum_s score
            ],
        ),
        compiler_params=pltpu.CompilerParams(
            dimension_semantics=("parallel", "arbitrary")),
    )(query, values, w1, b1_2d, vw_2d, vb_2d)

    return ctx3.reshape(B, Dv), score


def _reference(query, values, w1, b1, v_w, v_b):
    """Pure-JAX reference mirroring the PyTorch module."""
    h = jnp.tanh(query @ w1 + b1)                              # (B, S, Dout)
    score = jax.nn.sigmoid(h @ v_w[:, None] + v_b)             # (B, S, 1)
    attn = score / jnp.sum(score, axis=1, keepdims=True)
    ctx = jnp.sum(attn * values, axis=1)                       # (B, Dv)
    return ctx, score


if __name__ == "__main__":
    key = jax.random.PRNGKey(0)
    kq, kv, kw1, kb1, kvw, kvb = jax.random.split(key, 6)

    B, S, IN_UNITS, OUT_UNITS, DV = 2, 8, 32, 32, 32
    query = jax.random.normal(kq, (B, S, IN_UNITS), dtype=jnp.float32)
    values = jax.random.normal(kv, (B, S, DV), dtype=jnp.float32)
    w1 = 0.1 * jax.random.normal(kw1, (IN_UNITS, OUT_UNITS), dtype=jnp.float32)
    b1 = 0.1 * jax.random.normal(kb1, (OUT_UNITS,), dtype=jnp.float32)
    v_w = 0.1 * jax.random.normal(kvw, (OUT_UNITS,), dtype=jnp.float32)
    v_b = 0.1 * jax.random.normal(kvb, (), dtype=jnp.float32)

    ctx, score = self_attention(query, values, w1, b1, v_w, v_b)
    ctx, score = jax.block_until_ready((ctx, score))

    ctx_ref, score_ref = _reference(query, values, w1, b1, v_w, v_b)

    assert ctx.shape == (B, DV) and ctx.dtype == query.dtype
    assert score.shape == (B, S, 1) and score.dtype == query.dtype
    assert bool(jnp.allclose(ctx, ctx_ref, rtol=1e-4, atol=1e-5))
    assert bool(jnp.allclose(score, score_ref, rtol=1e-4, atol=1e-5))

    print("KERNEL_OK")
</pallas_src>

<mosaic_0001>
module attributes {stable_mosaic.version = 11 : i64} {
  func.func @_self_attention_kernel(%arg0: i32, %arg1: i32, %arg2: memref<1x8x32xf32, #tpu.memory_space<vmem>>, %arg3: memref<1x8x32xf32, #tpu.memory_space<vmem>>, %arg4: memref<32x32xf32, #tpu.memory_space<vmem>>, %arg5: memref<1x32xf32, #tpu.memory_space<vmem>>, %arg6: memref<1x32xf32, #tpu.memory_space<vmem>>, %arg7: memref<1x1xf32, #tpu.memory_space<vmem>>, %arg8: memref<1x1x32xf32, #tpu.memory_space<vmem>>, %arg9: memref<1x8x1xf32, #tpu.memory_space<vmem>>, %arg10: memref<1x32xf32, #tpu.memory_space<vmem>>, %arg11: memref<1x1xf32, #tpu.memory_space<vmem>>) attributes {dimension_semantics = [#tpu.dimension_semantics<parallel>, #tpu.dimension_semantics<arbitrary>], iteration_bounds = array<i64: 2, 1>, scalar_prefetch = 0 : i64, scratch_operands = 2 : i64, tpu.core_type = #tpu.core_type<tc>, window_params = [{transform_indices = @transform_0, window_bounds = array<i64: 1, 8, 32>}, {transform_indices = @transform_1, window_bounds = array<i64: 1, 8, 32>}, {pipeline_mode = #tpu.pipeline_mode<synchronous>, transform_indices = @transform_2, window_bounds = array<i64: 32, 32>}, {pipeline_mode = #tpu.pipeline_mode<synchronous>, transform_indices = @transform_3, window_bounds = array<i64: 1, 32>}, {pipeline_mode = #tpu.pipeline_mode<synchronous>, transform_indices = @transform_4, window_bounds = array<i64: 1, 32>}, {pipeline_mode = #tpu.pipeline_mode<synchronous>, transform_indices = @transform_5, window_bounds = array<i64: 1, 1>}, {transform_indices = @transform_6, window_bounds = array<i64: 1, 1, 32>}, {transform_indices = @transform_7, window_bounds = array<i64: 1, 8, 1>}]} {
    %c0_i32 = arith.constant 0 : i32
    %0 = arith.cmpi eq, %arg1, %c0_i32 : i32
    %1 = arith.extui %0 : i1 to i32
    %c0_i32_0 = arith.constant 0 : i32
    %2 = arith.cmpi ne, %1, %c0_i32_0 : i32
    scf.if %2 {
      %cst_33 = arith.constant 0.000000e+00 : f32
      %45 = vector.broadcast %cst_33 : f32 to vector<1x32xf32>
      %c0_34 = arith.constant 0 : index
      %c0_35 = arith.constant 0 : index
      %46 = vector.load %arg10[%c0_34, %c0_35] : memref<1x32xf32, #tpu.memory_space<vmem>>, vector<1x32xf32>
      tpu.vector_store %arg10[%c0_34, %c0_35], %45 {strides = array<i32>} : memref<1x32xf32, #tpu.memory_space<vmem>>, vector<1x32xf32>,
      %cst_36 = arith.constant 0.000000e+00 : f32
      %47 = vector.broadcast %cst_36 : f32 to vector<1x1xf32>
      %c0_37 = arith.constant 0 : index
      %c0_38 = arith.constant 0 : index
      %48 = vector.load %arg11[%c0_37, %c0_38] : memref<1x1xf32, #tpu.memory_space<vmem>>, vector<1x1xf32>
      tpu.vector_store %arg11[%c0_37, %c0_38], %47 {strides = array<i32>} : memref<1x1xf32, #tpu.memory_space<vmem>>, vector<1x1xf32>,
    } else {
    }
    %c0 = arith.constant 0 : index
    %c0_1 = arith.constant 0 : index
    %c0_2 = arith.constant 0 : index
    %3 = vector.load %arg2[%c0, %c0_1, %c0_2] : memref<1x8x32xf32, #tpu.memory_space<vmem>>, vector<1x8x32xf32>
    %4 = vector.shape_cast %3 : vector<1x8x32xf32> to vector<8x32xf32>
    %c0_3 = arith.constant 0 : index
    %c0_4 = arith.constant 0 : index
    %c0_5 = arith.constant 0 : index
    %5 = vector.load %arg3[%c0_3, %c0_4, %c0_5] : memref<1x8x32xf32, #tpu.memory_space<vmem>>, vector<1x8x32xf32>
    %6 = vector.shape_cast %5 : vector<1x8x32xf32> to vector<8x32xf32>
    %c0_6 = arith.constant 0 : index
    %c0_7 = arith.constant 0 : index
    %7 = vector.load %arg4[%c0_6, %c0_7] : memref<32x32xf32, #tpu.memory_space<vmem>>, vector<32x32xf32>
    %cst = arith.constant dense<0.000000e+00> : vector<8x32xf32>
    %8 = tpu.matmul %4, %7, %cst {dimension_numbers = #tpu.dot_dimension_numbers<[1], [0], [0], [1], [0, 0, 1, 1], [], []>} : vector<8x32xf32>, vector<32x32xf32>, vector<8x32xf32> -> vector<8x32xf32>
    %c0_8 = arith.constant 0 : index
    %c0_9 = arith.constant 0 : index
    %9 = vector.load %arg5[%c0_8, %c0_9] : memref<1x32xf32, #tpu.memory_space<vmem>>, vector<1x32xf32>
    %10 = vector.broadcast %9 : vector<1x32xf32> to vector<8x32xf32>
    %11 = arith.addf %8, %10 : vector<8x32xf32>
    %12 = math.tanh %11 : vector<8x32xf32>
    %c0_10 = arith.constant 0 : index
    %c0_11 = arith.constant 0 : index
    %13 = vector.load %arg6[%c0_10, %c0_11] : memref<1x32xf32, #tpu.memory_space<vmem>>, vector<1x32xf32>
    %14 = vector.broadcast %13 : vector<1x32xf32> to vector<8x32xf32>
    %15 = arith.mulf %12, %14 : vector<8x32xf32>
    %cst_12 = arith.constant dense<0.000000e+00> : vector<8xf32>
    %16 = vector.multi_reduction <add>, %15, %cst_12 [1] : vector<8x32xf32> to vector<8xf32>
    %17 = vector.shape_cast %16 : vector<8xf32> to vector<8x1xf32>
    %c0_13 = arith.constant 0 : index
    %c0_14 = arith.constant 0 : index
    %18 = vector.load %arg7[%c0_13, %c0_14] : memref<1x1xf32, #tpu.memory_space<vmem>>, vector<1x1xf32>
    %19 = vector.broadcast %18 : vector<1x1xf32> to vector<8x1xf32>
    %20 = arith.addf %17, %19 : vector<8x1xf32>
    %cst_15 = arith.constant 0.000000e+00 : f32
    %21 = vector.broadcast %cst_15 : f32 to vector<8x1xf32>
    %22 = arith.subf %21, %20 : vector<8x1xf32>
    %23 = math.exp %22 : vector<8x1xf32>
    %cst_16 = arith.constant 1.000000e+00 : f32
    %24 = vector.broadcast %cst_16 : f32 to vector<8x1xf32>
    %25 = arith.addf %24, %23 : vector<8x1xf32>
    %cst_17 = arith.constant 1.000000e+00 : f32
    %26 = vector.broadcast %cst_17 : f32 to vector<8x1xf32>
    %27 = arith.divf %26, %25 : vector<8x1xf32>
    %28 = vector.shape_cast %27 : vector<8x1xf32> to vector<1x8x1xf32>
    %c0_18 = arith.constant 0 : index
    %c0_19 = arith.constant 0 : index
    %c0_20 = arith.constant 0 : index
    %29 = vector.load %arg9[%c0_18, %c0_19, %c0_20] : memref<1x8x1xf32, #tpu.memory_space<vmem>>, vector<1x8x1xf32>
    tpu.vector_store %arg9[%c0_18, %c0_19, %c0_20], %28 {strides = array<i32>} : memref<1x8x1xf32, #tpu.memory_space<vmem>>, vector<1x8x1xf32>,
    %c0_21 = arith.constant 0 : index
    %c0_22 = arith.constant 0 : index
    %30 = vector.load %arg10[%c0_21, %c0_22] : memref<1x32xf32, #tpu.memory_space<vmem>>, vector<1x32xf32>
    %31 = vector.broadcast %27 : vector<8x1xf32> to vector<8x32xf32>
    %32 = arith.mulf %31, %6 : vector<8x32xf32>
    %cst_23 = arith.constant dense<0.000000e+00> : vector<32xf32>
    %33 = vector.multi_reduction <add>, %32, %cst_23 [0] : vector<8x32xf32> to vector<32xf32>
    %34 = vector.shape_cast %33 : vector<32xf32> to vector<1x32xf32>
    %35 = arith.addf %30, %34 : vector<1x32xf32>
    %c0_24 = arith.constant 0 : index
    %c0_25 = arith.constant 0 : index
    %36 = vector.load %arg10[%c0_24, %c0_25] : memref<1x32xf32, #tpu.memory_space<vmem>>, vector<1x32xf32>
    tpu.vector_store %arg10[%c0_24, %c0_25], %35 {strides = array<i32>} : memref<1x32xf32, #tpu.memory_space<vmem>>, vector<1x32xf32>,
    %c0_26 = arith.constant 0 : index
    %c0_27 = arith.constant 0 : index
    %37 = vector.load %arg11[%c0_26, %c0_27] : memref<1x1xf32, #tpu.memory_space<vmem>>, vector<1x1xf32>
    %cst_28 = arith.constant dense<0.000000e+00> : vector<1xf32>
    %38 = vector.multi_reduction <add>, %27, %cst_28 [0] : vector<8x1xf32> to vector<1xf32>
    %39 = vector.shape_cast %38 : vector<1xf32> to vector<1x1xf32>
    %40 = arith.addf %37, %39 : vector<1x1xf32>
    %c0_29 = arith.constant 0 : index
    %c0_30 = arith.constant 0 : index
    %41 = vector.load %arg11[%c0_29, %c0_30] : memref<1x1xf32, #tpu.memory_space<vmem>>, vector<1x1xf32>
    tpu.vector_store %arg11[%c0_29, %c0_30], %40 {strides = array<i32>} : memref<1x1xf32, #tpu.memory_space<vmem>>, vector<1x1xf32>,
    %c0_i32_31 = arith.constant 0 : i32
    %42 = arith.cmpi eq, %arg1, %c0_i32_31 : i32
    %43 = arith.extui %42 : i1 to i32
    %c0_i32_32 = arith.constant 0 : i32
    %44 = arith.cmpi ne, %43, %c0_i32_32 : i32
    scf.if %44 {
      %c0_33 = arith.constant 0 : index
      %c0_34 = arith.constant 0 : index
      %45 = vector.load %arg11[%c0_33, %c0_34] : memref<1x1xf32, #tpu.memory_space<vmem>>, vector<1x1xf32>
      %46 = tpu.reciprocal %45 : vector<1x1xf32> -> vector<1x1xf32>
      %c0_35 = arith.constant 0 : index
      %c0_36 = arith.constant 0 : index
      %47 = vector.load %arg10[%c0_35, %c0_36] : memref<1x32xf32, #tpu.memory_space<vmem>>, vector<1x32xf32>
      %48 = vector.broadcast %46 : vector<1x1xf32> to vector<1x32xf32>
      %49 = arith.mulf %47, %48 : vector<1x32xf32>
      %50 = vector.shape_cast %49 : vector<1x32xf32> to vector<1x1x32xf32>
      %c0_37 = arith.constant 0 : index
      %c0_38 = arith.constant 0 : index
      %c0_39 = arith.constant 0 : index
      %51 = vector.load %arg8[%c0_37, %c0_38, %c0_39] : memref<1x1x32xf32, #tpu.memory_space<vmem>>, vector<1x1x32xf32>
      tpu.vector_store %arg8[%c0_37, %c0_38, %c0_39], %50 {strides = array<i32>} : memref<1x1x32xf32, #tpu.memory_space<vmem>>, vector<1x1x32xf32>,
    } else {
    }
    return
  }
  func.func @transform_0(%arg0: i32, %arg1: i32) -> (i32, i32, i32) {
    %c0_i32 = arith.constant 0 : i32
    %c0_i32_0 = arith.constant 0 : i32
    return %arg0, %arg1, %c0_i32 : i32, i32, i32
  }
  func.func @transform_1(%arg0: i32, %arg1: i32) -> (i32, i32, i32) {
    %c0_i32 = arith.constant 0 : i32
    %c0_i32_0 = arith.constant 0 : i32
    return %arg0, %arg1, %c0_i32 : i32, i32, i32
  }
  func.func @transform_2(%arg0: i32, %arg1: i32) -> (i32, i32) {
    %c0_i32 = arith.constant 0 : i32
    %c0_i32_0 = arith.constant 0 : i32
    %c0_i32_1 = arith.constant 0 : i32
    return %c0_i32, %c0_i32_0 : i32, i32
  }
  func.func @transform_3(%arg0: i32, %arg1: i32) -> (i32, i32) {
    %c0_i32 = arith.constant 0 : i32
    %c0_i32_0 = arith.constant 0 : i32
    %c0_i32_1 = arith.constant 0 : i32
    return %c0_i32, %c0_i32_0 : i32, i32
  }
  func.func @transform_4(%arg0: i32, %arg1: i32) -> (i32, i32) {
    %c0_i32 = arith.constant 0 : i32
    %c0_i32_0 = arith.constant 0 : i32
    %c0_i32_1 = arith.constant 0 : i32
    return %c0_i32, %c0_i32_0 : i32, i32
  }
  func.func @transform_5(%arg0: i32, %arg1: i32) -> (i32, i32) {
    %c0_i32 = arith.constant 0 : i32
    %c0_i32_0 = arith.constant 0 : i32
    %c0_i32_1 = arith.constant 0 : i32
    return %c0_i32, %c0_i32_0 : i32, i32
  }
  func.func @transform_6(%arg0: i32, %arg1: i32) -> (i32, i32, i32) {
    %c0_i32 = arith.constant 0 : i32
    %c0_i32_0 = arith.constant 0 : i32
    %c0_i32_1 = arith.constant 0 : i32
    return %arg0, %c0_i32, %c0_i32_0 : i32, i32, i32
  }
  func.func @transform_7(%arg0: i32, %arg1: i32) -> (i32, i32, i32) {
    %c0_i32 = arith.constant 0 : i32
    %c0_i32_0 = arith.constant 0 : i32
    return %arg0, %arg1, %c0_i32 : i32, i32, i32
  }
}

</mosaic_0001>

<bundles_post_ra>
// kernel: tpu_custom_call.1
= control target key start
LH: loop header
LB: loop body
LE: loop exit
PB: predicated region body
PF: predicated region fallthrough
CT: control target
= control target key end

     0   :  { %s1200_s0 = inlined_call_operand.hbm [shape: f32[2,8,32], index: 0, kind: input, shape index: {}]   ;;  %s1201_s1 = inlined_call_operand.hbm [shape: f32[2,8,32], index: 1, kind: input, shape index: {}]   ;;  %s1202_s2 = inlined_call_operand.hbm [shape: f32[32,32], index: 2, kind: input, shape index: {}]   ;;  %s1203_s3 = inlined_call_operand.vmem [shape: f32[1,32], index: 3, kind: input, shape index: {}]   ;;  %s1204_s4 = inlined_call_operand.vmem [shape: f32[1,32], index: 4, kind: input, shape index: {}]   ;;  %s1205_s5 = inlined_call_operand.<no memory space> [shape: f32[1,1], index: 5, kind: input, shape index: {}]   ;;  %s1206_s6 = inlined_call_operand.hbm [shape: f32[2,1,32], index: 6, kind: output, shape index: {0}]   ;;  %s1207_s7 = inlined_call_operand.vmem [shape: f32[2,8,1], index: 7, kind: output, shape index: {1}]  }
   0x1   :  { %1213 = sst [smem:[#allocation22_spill]] %s1202_s2  ;;  %v13_v0 = vstv %s1205_s5 }
   0x2   :  { %14 = vst [vmem:[#allocation4] sm:$0x1] %v13_v0 }
   0x3   :  { %15 = vsyncpa [#allocation6], 0 }
   0x4   :  { %17 = vsyncpa [#allocation6 + $0x1], 0 }
   0x5   :  { %18 = vsyncpa [#allocation9], 0 }
   0x6   :  { %20 = vsyncpa [#allocation9 + $0x1], 0 }
   0x7   :  { %21 = vsyncpa [#allocation7], 0 }
   0x8   :  { %23 = vsyncpa [#allocation7 + $0x1], 0  ;;  %s1025_s26 = smov 0   ;;  %s1027_s27 = smov 0  }
   0x9   :  { %s1029_s28 = smov 0   ;;  %s1031_s29 = smov 0  }
   0xa   :  { %s1033_s30 = smov 0   ;;  %s1035_s8 = smov 0  }
   0xb LB: > { %1214 = sst [smem:[#allocation16_spill]] %s955_s26  ;;  %s1056_s5 = sadd.s32 4294967295, %s975_s8   ;;  %s975_s8 = sphi %s1035_s8, %s29_s8   ;;  %s971_s30 = sphi %s1033_s30, %s1231_s30   ;;  %s967_s29 = sphi %s1031_s29, %s1230_s29   ;;  %s963_s28 = sphi %s1029_s28, %s1229_s28   ;;  %s959_s27 = sphi %s1027_s27, %s1233_s27   ;;  %s955_s26 = sphi %s1025_s26, %s1232_s26  }
   0xc   : > { %1215 = sst [smem:[#allocation17_spill]] %s963_s28  ;;  %p685_p0 = scmp.ge.s32.totalorder %s975_s8, 1 }
   0xd   : > { %1216 = sst [smem:[#allocation18_spill]] %s971_s30  ;;  %p64_p1 = scmp.eq.s32.totalorder %s1056_s5, 0 }
   0xe   : > { %p240_p2 = scmp.lt.s32.totalorder %s975_s8, 3  ;;  %s1217_s2 = sld [smem:[#allocation22_spill]] }
   0xf   : > { %s977_s13 = smov [#allocation10]   ;;  %p687_p6 = scmp.ge.s32.totalorder %s975_s8, 2 }
  0x10   : > { %p1064_p3 = pnand %p685_p0, %p240_p2  ;;  %s253_s14 = sshll.u32 %s977_s13, 4  ;;  %s254_s14 = int_to_ptr.vmem [resolvable:$true] %s253_s14 }
  0x11   : > { %s978_s15 = smov 128   ;;  %s979_s16 = smov 8  }
  0x12   : > { %p710_p4 = pneg %p1064_p3  ;;  %s684_s17 = sadd.s32 4294967294, %s975_s8  }
  0x13   : > { %s41_s18 = sadd.s32 1, %s971_s30  ;;  %s50_s19 = sadd.s32 1, %s963_s28 }
  0x14   : > { %s251_s11 = sshll.u32 %s1217_s2, 4  ;;  %p711_p5 = pnand %p710_p4, %p64_p1  ;;  %s252_s11 = int_to_ptr.hbm [resolvable:$true] %s251_s11 }
  0x15   : > { %p43_p7 = scmp.ge.s32.totalorder %s41_s18, 2  ;;  %p57_p8 = scmp.ne.s32.totalorder %s963_s28, %s959_s27 }
  0x16   : > { %713 = dma.hbm_to_vmem [thread:$0]  (!%p711_p5), %s252_s11, 512, %s254_s14, [#allocation9], %s978_s15, %s978_s15, %s979_s16  }
  0x17   : > { %p58_p9 = scmp.eq.s32.totalorder %s975_s8, 0  ;;  %p63_p10 = scmp.ne.s32.totalorder %s959_s27, %s955_s26 }
  0x18   : > { %s1235_s18 = smov (%p43_p7, %s41_s18), 0  ;;  %p199_p13 = scmp.eq.s32.totalorder %s1056_s5, 1 }
  0x19   : > { %1219 = sst [smem:[#allocation19_spill]] %s1235_s18  ;;  %p1083_p11 = por %p58_p9, %p57_p8 }
  0x1a   : > { %p1089_p12 = por %p64_p1, %p63_p10  ;;  %s45_s22 = ssub.s32 %s971_s30, %s1235_s18 }
  0x1b   : > { %p48_p0 = scmp.eq.s32.totalorder %s45_s22, 0  ;;  %p205_p2 = scmp.eq.s32.totalorder %s684_s17, 1 }
  0x1c   : > { %p1096_p4 = por %p199_p13, %p57_p8  ;;  %p726_p5 = scmp.lt.s32.totalorder %s975_s8, 2 }
  0x1d   : > { %s1102_s24 = scalar_select %p48_p0, %s963_s28, %s50_s19  }
  0x1e   : > { %p1104_p7 = por %p205_p2, %p63_p10  ;;  %s276_s9 = sand.u32 1, %s963_s28  }
  0x1f   : > { %1223 = sst [smem:[#allocation20_spill]] %s1102_s24  ;;  %s688_s10 = sshll.u32 %s276_s9, 3 }
  0x20   : > { %s1224_s25 = scalar_select %p1104_p7, 1, 0 }
  0x21   : > { %s689_s11 = sshll.u32 %s971_s30, 3  ;;  %s280_s16 = scalar_lea.vmem [#allocation5], %s688_s10 }
  0x22   : > { %1225 = sst [smem:[#allocation21_spill]] %s1224_s25  ;;  %s285_s15 = scalar_lea.hbm %s1200_s0, %s689_s11 }
  0x23   : > { %s289_s17 = sshll.u32 %s280_s16, 4  ;;  %s287_s22 = sshll.u32 %s285_s15, 4  ;;  %s290_s17 = int_to_ptr.vmem [resolvable:$true] %s289_s17  ;;  %s288_s22 = int_to_ptr.hbm [resolvable:$true] %s287_s22 }
  0x24   : > { %p715_p8 = pnand %p726_p5, %p1083_p11  ;;  %s305_s18 = scalar_lea.hbm %s1201_s1, %s689_s11 }
  0x25   : > { %s296_s24 = sand.u32 1, %s975_s8   ;;  %s277_s25 = scalar_lea.sflag [#allocation6], %s276_s9 }
  0x26   : > { %717 = dma.hbm_to_vmem [thread:$0]  (!%p715_p8), %s288_s22, 128, %s290_s17, %s277_s25  }
  0x27   : > { %s307_s28 = sshll.u32 %s305_s18, 4  ;;  %s300_s30 = scalar_lea.vmem [#allocation8], %s688_s10  ;;  %s308_s28 = int_to_ptr.hbm [resolvable:$true] %s307_s28 }
  0x28   : > { %s309_s26 = sshll.u32 %s300_s30, 4  ;;  %s297_s13 = scalar_lea.sflag [#allocation9], %s296_s24  ;;  %s310_s26 = int_to_ptr.vmem [resolvable:$true] %s309_s26 }
  0x29   : > { %720 = dma.hbm_to_vmem [thread:$0]  (!%p715_p8), %s308_s28, 128, %s310_s26, %s297_s13  }
  0x2a   : > { %318 = sbr.rel (%p1064_p3) target bundleno = 509 (0x1fd), region = 44  ;;  %s1122_s20 = sand.u32 (!%p1064_p3), 1, %s959_s27  }
  0x2b   : > { %s693_s2 = sshll.u32 (!%p1064_p3), %s1122_s20, 3  ;;  %s321_s11 = scalar_lea.sflag (!%p1064_p3), [#allocation6], %s1122_s20 }
  0x2c   : > { %s324_s9 = scalar_lea.vmem (!%p1064_p3), [#allocation5], %s693_s2 }
  0x2f   : > { %938 = dma.done.wait (%p1089_p12), %s321_s11, 128  }
  0x30   : > { %940 = vsyncadd (%p1089_p12), %s321_s11, 4294967168  ;;  %s330_s26 = sand.u32 1, %s1056_s5   ;;  %s1131_s30 = scalar_lea.vmem [#allocation8], %s693_s2 }
  0x31   : > { %s331_s28 = scalar_lea.sflag [#allocation9], %s330_s26 }
  0x32   : > { %942 = dma.done.wait (%p1089_p12), %s331_s28, 128  }
  0x33   : > { %944 = vsyncadd (%p1089_p12), %s331_s28, 4294967168 }
  0x34   : > { %946 = dma.done.wait (%p64_p1), [#allocation9], 512  }
  0x35   : > { %948 = vsyncadd (%p64_p1), [#allocation9], 4294966784  ;;  %v402_v1 = vld [vmem:[#allocation10 + $0x18] sm:$0xff]  ;;  %v401_v2 = vld [vmem:[#allocation10 + $0x10] sm:$0xff]  ;;  %vm407_vm0 = vcmask 261120   ;;  %vm395_vm1 = vcmask 0   ;;  %s537_s22 = scalar_lea.hbm %s1206_s6, %s967_s29 }
  0x36   : > { %423 = vmatpush.msra.mxu0 %v402_v1  ;;  %v400_v3 = vld [vmem:[#allocation10 + $0x8] sm:$0xff]  ;;  %v399_v4 = vld [vmem:[#allocation10] sm:$0xff]  ;;  %v784_v6 = vld [vmem:[%s1203_s3] ss:$0 sm:$0xff]  ;;  %v980_v13 = vmov 0   ;;  %v981_v14 = vmov 0.0  }
  0x37   : > { %v397_v5 = vld [vmem:[%s324_s9] sm:$0xff]  ;;  %v785_v9 = vld [vmem:[%s1204_s4] ss:$0 sm:$0xff]  ;;  %782 = vset.pattern.permute.xlu0 %v980_v13  ;;  %396 = vst.msk [vmem:[#allocation3] sm:$0x1] %vm395_vm1, %v981_v14  ;;  %783 = vset.pattern.permute.xlu1 %v980_v13  ;;  %p382_p1 = scmp.lt.s32.totalorder %s967_s29, 1 }
  0x38   : > { %424 = vmatpush.msra.mxu0 %v401_v2  ;;  %v786_v15 = vld [vmem:[#allocation4] ss:$0 sm:$0xff]  ;;  %vm464_vm5 = vcmask 7168   ;;  %vm393_vm7 = vcmask 253952   ;;  %s372_s19 = scalar_lea.vmem [#allocation11], %s1122_s20  ;;  %s541_s2 = sshll.u32 %s537_s22, 4  ;;  %s542_s2 = int_to_ptr.hbm [resolvable:$true] %s541_s2 }
  0x39   : > { %s383_s24 = scalar_select %p382_p1, %s967_s29, 1  ;;  %394 = vst.msk [vmem:[#allocation2] sm:$0x1] %vm393_vm7, %v981_v14  ;;  %v398_v52 = vld [vmem:[%s1131_s30] sm:$0xff] }
  0x3a   : > { %425 = vmatpush.msra.mxu0 %v400_v3  ;;  %s539_s13 = sshll.u32 %s372_s19, 4  ;;  %s522_s11 = scalar_lea.sflag [#allocation7], %s1122_s20  ;;  %s540_s13 = int_to_ptr.vmem [resolvable:$true] %s539_s13 }
  0x3b   : > { %s696_s25 = sshll.u32 %s383_s24, 3  ;;  %s899_s9 = sshra.s32 %s542_s2, 4  ;;  %s900_s9 = int_to_ptr.hbm [resolvable:$true] %s899_s9 }
  0x3c   : > { %426 = vmatpush.msra.mxu0 %v399_v4  ;;  %s388_s15 = scalar_lea.vmem %s1207_s7, %s696_s25  ;;  %s901_s26 = scalar_lea.hbm %s900_s9, 1 }
  0x3d   : > { %697 = vmatmul.msk.f32.vlgmr.msra.gmra.mxu0 %vm407_vm0, %v397_v5  ;;  %p902_p3 = scmp.ne.s32.totalorder %s900_s9, %s901_s26  ;;  %s905_s30 = scalar_lea.hbm %s1206_s6, 2 }
  0x3e   : > { %v483_v38 = vld [vmem:[#allocation3] sm:$0x1]  ;;  %p906_p11 = scmp.lt.s32.totalorder %s900_s9, %s1206_s6  ;;  %p907_p12 = scmp.lt.s32.totalorder %s905_s30, %s901_s26 }
  0x3f   : > { %p903_p9 = pnand %p902_p3, %p1096_p4 }
  0x40   : > { %v466_v61 = vld [vmem:[#allocation2] sm:$0x1]  ;;  %p908_p13 = por %p907_p12, %p906_p11 }
  0x41   : > { %p904_p10 = pneg %p903_p9 }
  0x43   : > { %p909_p0 = pnand %p908_p13, %p904_p10 }
  0xba   : > { %v428_v7 = vpop.f32.mrf.mxu0 }
  0xbb   : > { %v429_v8 = vadd.f32 %v784_v6, %v428_v7 }
  0xbd   : > { %787 = vtanh.f32 %v429_v8 }
  0xc3   : > { %v788_v10 = vpop.eup %787 }
  0xc4   : > { %v436_v11 = vmul.f32 %v788_v10, %v785_v9 }
  0xc6   : > { %v437_v12 = vsel %vm407_vm0, %v436_v11, 0.0 }
  0xc7   : > { %438 = vadd.xlane.f32.xlu0 %v437_v12 }
 0x13a   : > { %v439_v16 = vpop.xlane.xlu0 %438 }
 0x13b   : > { %v444_v17 = vadd.f32 %v786_v15, %v439_v16 }
 0x13d   : > { %v445_v18 = vsub.f32 0.0, %v444_v17 }
 0x13f   : > { %v446_v19 = vmul.f32 1.442695, %v445_v18 }
 0x141   : > { %789 = vpow2.f32 %v446_v19 }
 0x147   : > { %v790_v20 = vpop.eup %789 }
 0x148   : > { %v448_v21 = vadd.f32 1.0, %v790_v20 }
 0x14a   : > { %791 = vrcp.f32 %v448_v21  ;;  %v460_v25 = vand.u32 2147483648, %v448_v21  ;;  %v458_v27 = vand.u32 2147483647, %v448_v21  ;;  %vm454_vm3 = vweird.f32 %v448_v21 }
 0x14c   : > { %v461_v29 = vor.u32 1.1754944e-38, %v460_v25  ;;  %vm459_vm6 = vcmp.eq.f32.partialorder %v458_v27, 8.507059e+37 }
 0x150   : > { %v792_v22 = vpop.eup %791 }
 0x151   : > { %v450_v23 = vmul.f32 %v792_v22, %v448_v21  ;;  %vm455_vm2 = vweird.f32 %v792_v22 }
 0x152   : > { %vm456_vm4 = vmor %vm454_vm3, %vm455_vm2 }
 0x153   : > { %v451_v24 = vsub.f32 1.0, %v450_v23 }
 0x155   : > { %v452_v26 = vmul.f32 %v792_v22, %v451_v24 }
 0x157   : > { %v453_v28 = vadd.f32 %v792_v22, %v452_v26 }
 0x159   : > { %v457_v30 = vsel %vm456_vm4, %v792_v22, %v453_v28 }
 0x15a   : > { %v462_v31 = vsel %vm459_vm6, %v461_v29, %v457_v30 }
 0x15b   : > { %469 = vperm.xlu0 %782, %v462_v31   ;;  %465 = vst.msk [vmem:[%s388_s15] sm:$0xff] %vm464_vm5, %v462_v31  ;;  %v484_v32 = vsel %vm464_vm5, %v462_v31, 0.0 }
 0x15c   : > { %v485_v33 = vrot.slane %v484_v32, 4 }
 0x15e   : > { %v486_v34 = vadd.f32 %v485_v33, %v484_v32 }
 0x160   : > { %v487_v35 = vrot.slane %v486_v34, 2 }
 0x162   : > { %v488_v36 = vadd.f32 %v487_v35, %v486_v34 }
 0x164   : > { %v489_v37 = vrot.slane %v488_v36, 1 }
 0x166   : > { %v490_v39 = vadd.f32 %v489_v37, %v488_v36 }
 0x168   : > { %v491_v40 = vadd.f32 %v490_v39, %v483_v38 }
 0x16a   : > { %493 = vst.msk [vmem:[#allocation3] sm:$0x1] %vm395_vm1, %v491_v40 }
 0x171   : > { %v497_v41 = vld [vmem:[#allocation3] sm:$0x1] }
 0x172   : > { %793 = vrcp.f32 %v497_v41  ;;  %v509_v45 = vand.u32 2147483648, %v497_v41  ;;  %v507_v47 = vand.u32 2147483647, %v497_v41  ;;  %vm503_vm9 = vweird.f32 %v497_v41 }
 0x174   : > { %v510_v49 = vor.u32 1.1754944e-38, %v509_v45  ;;  %vm508_vm11 = vcmp.eq.f32.partialorder %v507_v47, 8.507059e+37 }
 0x178   : > { %v794_v42 = vpop.eup %793 }
 0x179   : > { %v499_v43 = vmul.f32 %v794_v42, %v497_v41  ;;  %vm504_vm8 = vweird.f32 %v794_v42 }
 0x17a   : > { %vm505_vm10 = vmor %vm503_vm9, %vm504_vm8 }
 0x17b   : > { %v500_v44 = vsub.f32 1.0, %v499_v43 }
 0x17d   : > { %v501_v46 = vmul.f32 %v794_v42, %v500_v44 }
 0x17f   : > { %v502_v48 = vadd.f32 %v794_v42, %v501_v46 }
 0x181   : > { %v506_v50 = vsel %vm505_vm10, %v794_v42, %v502_v48 }
 0x182   : > { %v511_v51 = vsel %vm508_vm11, %v510_v49, %v506_v50 }
 0x183   : > { %515 = vperm.xlu1 %783, %v511_v51  }
 0x1cd   : > { %v470_v53 = vpop.permute.xlu0 %469 }
 0x1ce   : > { %v472_v54 = vmul.f32 %v470_v53, %v398_v52 }
 0x1d0   : > { %v473_v55 = vsel %vm407_vm0, %v472_v54, 0.0 }
 0x1d1   : > { %v474_v56 = vrot.slane %v473_v55, 4 }
 0x1d3   : > { %v475_v57 = vadd.f32 %v474_v56, %v473_v55 }
 0x1d5   : > { %v476_v58 = vrot.slane %v475_v57, 2 }
 0x1d7   : > { %v477_v59 = vadd.f32 %v476_v58, %v475_v57 }
 0x1d9   : > { %v478_v60 = vrot.slane %v477_v59, 1 }
 0x1db   : > { %v479_v62 = vadd.f32 %v478_v60, %v477_v59 }
 0x1dd   : > { %v480_v63 = vadd.f32 %v479_v62, %v466_v61 }
 0x1df   : > { %482 = vst.msk [vmem:[#allocation2] sm:$0x1] %vm393_vm7, %v480_v63 }
 0x1e6   : > { %v512_v2 = vld [vmem:[#allocation2] sm:$0x1] }
 0x1f5   : > { %v516_v0 = vpop.permute.xlu1 %515 }
 0x1f6   : > { %v518_v1 = vperm.slane %v516_v0, 0 }
 0x1f8   : > { %v519_v3 = vmul.f32 %v518_v1, %v512_v2 }
 0x1fa   : > { %520 = vst.msk [vmem:[%s372_s19] sm:$0x1] %vm393_vm7, %v519_v3 }
 0x1fb   : > { %912 = shalt.err (!%p909_p0)
}
 0x1fc   : > { %708 = dma.vmem_to_hbm [thread:$0]  (%p1096_p4), %s540_s13, 16, %s542_s2, %s522_s11  }
 0x1fd PF: > { %s1226_s20 = sld [smem:[#allocation16_spill]]  ;;  %p722_p2 = pnand %p687_p6, %p1104_p7 }
 0x1ff   : > { %p723_p5 = pneg %p722_p2 }
 0x203   : > { %s556_s21 = sand.u32 1, %s1226_s20  }
 0x204   : > { %s557_s24 = scalar_lea.sflag [#allocation7], %s556_s21 }
 0x205   : > { %950 = dma.done.wait (%p723_p5), %s557_s24, 16  }
 0x206   : > { %952 = vsyncadd (%p723_p5), %s557_s24, 4294967280  ;;  %s29_s8 = sadd.s32 1, %s975_s8   ;;  %s1228_s25 = sld [smem:[#allocation17_spill]] }
 0x207   : > { %p26_p8 = scmp.ge.s32.totalorder %s29_s8, 4   ;;  %s1229_s28 = sld [smem:[#allocation20_spill]] }
 0x208   : > { %s1230_s29 = sld [smem:[#allocation18_spill]]  ;;  %s1232_s26 = smov %s959_s27 }
 0x209   : > { %s1231_s30 = sld [smem:[#allocation19_spill]]  ;;  %28 = sbr.rel (!%p26_p8) target bundleno = 11 (0xb), region = 126 }
 0x20c   : > { %s1233_s27 = smov %s1228_s25 }
 0x20e   :  { %572 = vsyncpa [#allocation6], 1 }
 0x20f   :  { %574 = vsyncpa [#allocation6 + $0x1], 1 }
 0x210   :  { %575 = vsyncpa [#allocation9], 1 }
 0x211   :  { %577 = vsyncpa [#allocation9 + $0x1], 1 }
 0x212   :  { %578 = vsyncpa [#allocation7], 1 }
 0x213   :  { %580 = vsyncpa [#allocation7 + $0x1], 1 }

</bundles_post_ra>
